<compile_context>
chip_gen: v7x
topology: tpu7x:2x2x1
jax: 0.10.0
libtpu: 0.0.40
codegen_flags: <defaults>
</compile_context>

<pallas_src>
import functools

import jax
import jax.numpy as jnp
from jax.experimental import pallas as pl
from jax.experimental.pallas import tpu as pltpu


def _mlp_kernel(x_ref, w1_ref, b1_ref, w2_ref, b2_ref, w3_ref, b3_ref, o_ref):
    # Layer 1: Linear + ReLU  (MXU matmul, f32 accumulate)
    h1 = jnp.dot(x_ref[...], w1_ref[...], preferred_element_type=jnp.float32)
    h1 = jnp.maximum(h1 + b1_ref[...], 0.0)
    # Layer 2: Linear + ReLU
    h2 = jnp.dot(h1, w2_ref[...], preferred_element_type=jnp.float32)
    h2 = jnp.maximum(h2 + b2_ref[...], 0.0)
    # Layer 3: Linear (no activation); store the true out_dim directly
    # (last block dim == full array dim, so no lane padding is needed).
    out = jnp.dot(h2, w3_ref[...], preferred_element_type=jnp.float32)
    o_ref[...] = (out + b3_ref[...]).astype(o_ref.dtype)


@functools.partial(jax.jit, static_argnames=("block_b",))
def mlp_forward(x, w1, b1, w2, b2, w3, b3, *, block_b=1024):
    """Fused 3-layer MLP forward. x: (B, in_dim) float32. Returns (B, out_dim)."""
    B, in_dim = x.shape
    hidden = w1.shape[1]
    mid = w2.shape[1]
    out_dim = w3.shape[1]

    # Clamp the batch tile for small B (keep it a multiple of 8 sublanes);
    # no padding of x or the output is performed — Pallas masks the edge block.
    eff_block_b = min(block_b, ((B + 7) // 8) * 8)
    n_blocks = pl.cdiv(B, eff_block_b)
    grid = (n_blocks,)

    return pl.pallas_call(
        _mlp_kernel,
        out_shape=jax.ShapeDtypeStruct((B, out_dim), x.dtype),
        grid=grid,
        in_specs=[
            # x: tile over batch; features = full array dim (lane rule satisfied).
            pl.BlockSpec((eff_block_b, in_dim), lambda i: (i, 0)),
            # weights / biases: full arrays, resident in VMEM across the grid.
            pl.BlockSpec((in_dim, hidden), lambda i: (0, 0)),
            pl.BlockSpec((1, hidden), lambda i: (0, 0)),
            pl.BlockSpec((hidden, mid), lambda i: (0, 0)),
            pl.BlockSpec((1, mid), lambda i: (0, 0)),
            pl.BlockSpec((mid, out_dim), lambda i: (0, 0)),
            pl.BlockSpec((1, out_dim), lambda i: (0, 0)),
        ],
        # Output block last dim == out_dim (full array dim) -> legal, no padding,
        # minimal HBM writeback.
        out_specs=pl.BlockSpec((eff_block_b, out_dim), lambda i: (i, 0)),
        compiler_params=pltpu.CompilerParams(
            dimension_semantics=("parallel",),
        ),
    )(x, w1, b1, w2, b2, w3, b3)


def init_params(key, in_dim, out_dim, hidden=64):
    """Deterministic init mimicking PyTorch nn.Linear default
    (U(-1/sqrt(fan_in), 1/sqrt(fan_in))). Weights are in (in, out) layout."""
    dims = [(in_dim, hidden), (hidden, 32), (32, out_dim)]
    params = []
    for (fan_in, fan_out) in dims:
        key, kw, kb = jax.random.split(key, 3)
        bound = 1.0 / (fan_in ** 0.5)
        w = jax.random.uniform(kw, (fan_in, fan_out), jnp.float32, -bound, bound)
        b = jax.random.uniform(kb, (1, fan_out), jnp.float32, -bound, bound)
        params.extend([w, b])
    return params


def reference_forward(x, w1, b1, w2, b2, w3, b3):
    h1 = jnp.maximum(x @ w1 + b1, 0.0)
    h2 = jnp.maximum(h1 @ w2 + b2, 0.0)
    return h2 @ w3 + b3


if __name__ == "__main__":
    # Small shapes consistent with the module: in_dim=32, out_dim=16, hidden=64.
    # B=200 is deliberately NOT a multiple of the batch tile so the masked edge
    # block is exercised; block_b=128 gives a 2-step grid so the "parallel"
    # batch axis (v7x dual-TC sharding) is also exercised.
    B, in_dim, out_dim, hidden = 200, 32, 16, 64

    key = jax.random.PRNGKey(0)
    key, kx = jax.random.split(key)
    x = jax.random.normal(kx, (B, in_dim), jnp.float32)

    w1, b1, w2, b2, w3, b3 = init_params(key, in_dim, out_dim, hidden)

    out = mlp_forward(x, w1, b1, w2, b2, w3, b3, block_b=128)
    out = jax.block_until_ready(out)

    ref = reference_forward(x, w1, b1, w2, b2, w3, b3)
    assert out.shape == (B, out_dim)
    assert jnp.allclose(out, ref, atol=1e-5, rtol=1e-5), "mismatch vs JAX reference"

    print("KERNEL_OK")
</pallas_src>

<mosaic_0001>
module attributes {stable_mosaic.version = 11 : i64} {
  func.func @_mlp_kernel(%arg0: i32, %arg1: memref<128x32xf32, #tpu.memory_space<vmem>>, %arg2: memref<32x64xf32, #tpu.memory_space<vmem>>, %arg3: memref<1x64xf32, #tpu.memory_space<vmem>>, %arg4: memref<64x32xf32, #tpu.memory_space<vmem>>, %arg5: memref<1x32xf32, #tpu.memory_space<vmem>>, %arg6: memref<32x16xf32, #tpu.memory_space<vmem>>, %arg7: memref<1x16xf32, #tpu.memory_space<vmem>>, %arg8: memref<128x16xf32, #tpu.memory_space<vmem>>) attributes {dimension_semantics = [#tpu.dimension_semantics<parallel>], iteration_bounds = array<i64: 2>, scalar_prefetch = 0 : i64, scratch_operands = 0 : i64, tpu.core_type = #tpu.core_type<tc>, window_params = [{transform_indices = @transform_0, window_bounds = array<i64: 128, 32>}, {pipeline_mode = #tpu.pipeline_mode<synchronous>, transform_indices = @transform_1, window_bounds = array<i64: 32, 64>}, {pipeline_mode = #tpu.pipeline_mode<synchronous>, transform_indices = @transform_2, window_bounds = array<i64: 1, 64>}, {pipeline_mode = #tpu.pipeline_mode<synchronous>, transform_indices = @transform_3, window_bounds = array<i64: 64, 32>}, {pipeline_mode = #tpu.pipeline_mode<synchronous>, transform_indices = @transform_4, window_bounds = array<i64: 1, 32>}, {pipeline_mode = #tpu.pipeline_mode<synchronous>, transform_indices = @transform_5, window_bounds = array<i64: 32, 16>}, {pipeline_mode = #tpu.pipeline_mode<synchronous>, transform_indices = @transform_6, window_bounds = array<i64: 1, 16>}, {transform_indices = @transform_7, window_bounds = array<i64: 128, 16>}]} {
    %c0 = arith.constant 0 : index
    %c0_0 = arith.constant 0 : index
    %0 = vector.load %arg1[%c0, %c0_0] : memref<128x32xf32, #tpu.memory_space<vmem>>, vector<128x32xf32>
    %c0_1 = arith.constant 0 : index
    %c0_2 = arith.constant 0 : index
    %1 = vector.load %arg2[%c0_1, %c0_2] : memref<32x64xf32, #tpu.memory_space<vmem>>, vector<32x64xf32>
    %cst = arith.constant dense<0.000000e+00> : vector<128x64xf32>
    %2 = tpu.matmul %0, %1, %cst {dimension_numbers = #tpu.dot_dimension_numbers<[1], [0], [0], [1], [0, 0, 1, 1], [], []>} : vector<128x32xf32>, vector<32x64xf32>, vector<128x64xf32> -> vector<128x64xf32>
    %c0_3 = arith.constant 0 : index
    %c0_4 = arith.constant 0 : index
    %3 = vector.load %arg3[%c0_3, %c0_4] : memref<1x64xf32, #tpu.memory_space<vmem>>, vector<1x64xf32>
    %4 = vector.broadcast %3 : vector<1x64xf32> to vector<128x64xf32>
    %5 = arith.addf %2, %4 : vector<128x64xf32>
    %cst_5 = arith.constant 0.000000e+00 : f32
    %6 = vector.broadcast %cst_5 : f32 to vector<128x64xf32>
    %7 = arith.maximumf %5, %6 : vector<128x64xf32>
    %c0_6 = arith.constant 0 : index
    %c0_7 = arith.constant 0 : index
    %8 = vector.load %arg4[%c0_6, %c0_7] : memref<64x32xf32, #tpu.memory_space<vmem>>, vector<64x32xf32>
    %cst_8 = arith.constant dense<0.000000e+00> : vector<128x32xf32>
    %9 = tpu.matmul %7, %8, %cst_8 {dimension_numbers = #tpu.dot_dimension_numbers<[1], [0], [0], [1], [0, 0, 1, 1], [], []>} : vector<128x64xf32>, vector<64x32xf32>, vector<128x32xf32> -> vector<128x32xf32>
    %c0_9 = arith.constant 0 : index
    %c0_10 = arith.constant 0 : index
    %10 = vector.load %arg5[%c0_9, %c0_10] : memref<1x32xf32, #tpu.memory_space<vmem>>, vector<1x32xf32>
    %11 = vector.broadcast %10 : vector<1x32xf32> to vector<128x32xf32>
    %12 = arith.addf %9, %11 : vector<128x32xf32>
    %cst_11 = arith.constant 0.000000e+00 : f32
    %13 = vector.broadcast %cst_11 : f32 to vector<128x32xf32>
    %14 = arith.maximumf %12, %13 : vector<128x32xf32>
    %c0_12 = arith.constant 0 : index
    %c0_13 = arith.constant 0 : index
    %15 = vector.load %arg6[%c0_12, %c0_13] : memref<32x16xf32, #tpu.memory_space<vmem>>, vector<32x16xf32>
    %cst_14 = arith.constant dense<0.000000e+00> : vector<128x16xf32>
    %16 = tpu.matmul %14, %15, %cst_14 {dimension_numbers = #tpu.dot_dimension_numbers<[1], [0], [0], [1], [0, 0, 1, 1], [], []>} : vector<128x32xf32>, vector<32x16xf32>, vector<128x16xf32> -> vector<128x16xf32>
    %c0_15 = arith.constant 0 : index
    %c0_16 = arith.constant 0 : index
    %17 = vector.load %arg7[%c0_15, %c0_16] : memref<1x16xf32, #tpu.memory_space<vmem>>, vector<1x16xf32>
    %18 = vector.broadcast %17 : vector<1x16xf32> to vector<128x16xf32>
    %19 = arith.addf %16, %18 : vector<128x16xf32>
    %c0_17 = arith.constant 0 : index
    %c0_18 = arith.constant 0 : index
    %20 = vector.load %arg8[%c0_17, %c0_18] : memref<128x16xf32, #tpu.memory_space<vmem>>, vector<128x16xf32>
    tpu.vector_store %arg8[%c0_17, %c0_18], %19 {strides = array<i32>} : memref<128x16xf32, #tpu.memory_space<vmem>>, vector<128x16xf32>,
    return
  }
  func.func @transform_0(%arg0: i32) -> (i32, i32) {
    %c0_i32 = arith.constant 0 : i32
    %c0_i32_0 = arith.constant 0 : i32
    return %arg0, %c0_i32 : i32, i32
  }
  func.func @transform_1(%arg0: i32) -> (i32, i32) {
    %c0_i32 = arith.constant 0 : i32
    %c0_i32_0 = arith.constant 0 : i32
    %c0_i32_1 = arith.constant 0 : i32
    return %c0_i32, %c0_i32_0 : i32, i32
  }
  func.func @transform_2(%arg0: i32) -> (i32, i32) {
    %c0_i32 = arith.constant 0 : i32
    %c0_i32_0 = arith.constant 0 : i32
    %c0_i32_1 = arith.constant 0 : i32
    return %c0_i32, %c0_i32_0 : i32, i32
  }
  func.func @transform_3(%arg0: i32) -> (i32, i32) {
    %c0_i32 = arith.constant 0 : i32
    %c0_i32_0 = arith.constant 0 : i32
    %c0_i32_1 = arith.constant 0 : i32
    return %c0_i32, %c0_i32_0 : i32, i32
  }
  func.func @transform_4(%arg0: i32) -> (i32, i32) {
    %c0_i32 = arith.constant 0 : i32
    %c0_i32_0 = arith.constant 0 : i32
    %c0_i32_1 = arith.constant 0 : i32
    return %c0_i32, %c0_i32_0 : i32, i32
  }
  func.func @transform_5(%arg0: i32) -> (i32, i32) {
    %c0_i32 = arith.constant 0 : i32
    %c0_i32_0 = arith.constant 0 : i32
    %c0_i32_1 = arith.constant 0 : i32
    return %c0_i32, %c0_i32_0 : i32, i32
  }
  func.func @transform_6(%arg0: i32) -> (i32, i32) {
    %c0_i32 = arith.constant 0 : i32
    %c0_i32_0 = arith.constant 0 : i32
    %c0_i32_1 = arith.constant 0 : i32
    return %c0_i32, %c0_i32_0 : i32, i32
  }
  func.func @transform_7(%arg0: i32) -> (i32, i32) {
    %c0_i32 = arith.constant 0 : i32
    %c0_i32_0 = arith.constant 0 : i32
    return %arg0, %c0_i32 : i32, i32
  }
}

</mosaic_0001>

<bundles_post_ra>
// kernel: mlp_forward.1
= control target key start
LH: loop header
LB: loop body
LE: loop exit
PB: predicated region body
PF: predicated region fallthrough
CT: control target
= control target key end

     0   :  { %s1756_s24 = smov 0   ;;  %s1758_s25 = smov 0   ;;  %s2051_s0 = inlined_call_operand.vmem [shape: f32[200,32], index: 0, kind: input, shape index: {}]   ;;  %s2052_s1 = inlined_call_operand.vmem [shape: f32[32,64], index: 1, kind: input, shape index: {}]   ;;  %s2053_s2 = inlined_call_operand.vmem [shape: f32[1,64], index: 2, kind: input, shape index: {}]   ;;  %s2054_s3 = inlined_call_operand.vmem [shape: f32[64,32], index: 3, kind: input, shape index: {}]   ;;  %s2055_s4 = inlined_call_operand.vmem [shape: f32[1,32], index: 4, kind: input, shape index: {}]   ;;  %s2056_s5 = inlined_call_operand.vmem [shape: f32[32,16], index: 5, kind: input, shape index: {}]   ;;  %s2057_s6 = inlined_call_operand.vmem [shape: f32[1,16], index: 6, kind: input, shape index: {}]   ;;  %s2058_s7 = inlined_call_operand.vmem [shape: f32[200,16], index: 7, kind: output, shape index: {}]  }
   0x1   :  { %s1760_s26 = smov 0  }
   0x2 LB: > { %s1769_s27 = sadd.s32 4294967295, %s1682_s26   ;;  %s1771_s28 = sadd.s32 1, %s1682_s26   ;;  %s1682_s26 = sphi %s1760_s26, %s2065_s26   ;;  %s1678_s25 = sphi %s1758_s25, %s2064_s25   ;;  %s1674_s24 = sphi %s1756_s24, %s2063_s24  }
   0x3   : > { %s173_s29 = ssub.s32 %s1682_s26, %s1771_s28  ;;  %s176_s30 = sadd.s32 1, %s1678_s25 }
   0x4   : > { %p174_p0 = scmp.eq.s32.totalorder %s173_s29, 0  ;;  %p186_p1 = scmp.ne.s32.totalorder %s1678_s25, %s1674_s24 }
   0x5   : > { %p187_p2 = scmp.eq.s32.totalorder %s1769_s27, 1  ;;  %p1261_p3 = scmp.ge.s32.totalorder %s1682_s26, 1 }
   0x6   : > { %s1779_s8 = scalar_select %p174_p0, %s1678_s25, %s176_s30  }
   0x7   : > { %p1781_p4 = por %p187_p2, %p186_p1  ;;  %p246_p5 = scmp.lt.s32.totalorder %s1682_s26, 3 }
   0x9   : > { %p247_p6 = pnand %p1261_p3, %p246_p5 }
   0xa   : > { %v316_v0 = vld [vmem:[%s2052_s1] sm:$0xff] (!%p247_p6)  ;;  %v317_v1 = vld [vmem:[%s2052_s1 + $0x8] sm:$0xff] (!%p247_p6)  ;;  %v318_v2 = vld [vmem:[%s2052_s1 + $0x10] sm:$0xff] (!%p247_p6)  ;;  %s1795_s16 = sshll.u32 (!%p247_p6), %s1769_s27, 4  ;;  %vm327_vm0 = vcmask (!%p247_p6), 261120   ;;  %vm552_vm1 = vcmask (!%p247_p6), 523264  }
   0xb   : > { %250 = sbr.rel (%p247_p6) target bundleno = 753 (0x2f1), region = 48  ;;  %v1504_v3 = vpack.c.bf16 (!%p247_p6), %v317_v1, %v316_v0  ;;  %v319_v4 = vld [vmem:[%s2052_s1 + $0x18] sm:$0xff] (!%p247_p6)  ;;  %p286_p7 = scmp.lt.s32.totalorder (!%p247_p6), %s1795_s16, 24  ;;  %v537_v6 = vld [vmem:[%s2054_s3] sm:$0xff] (!%p247_p6)  ;;  %v538_v7 = vld [vmem:[%s2054_s3 + $0x8] sm:$0xff] (!%p247_p6)  ;;  %vm966_vm2 = vcmask (!%p247_p6), 130048  }
   0xc   : > { %v1508_v5 = vpack.c.bf16 (!%p247_p6), %v319_v4, %v318_v2  ;;  %v1512_v8 = vpack.c.bf16 (!%p247_p6), %v538_v7, %v537_v6  ;;  %v539_v10 = vld [vmem:[%s2054_s3 + $0x10] sm:$0xff] (!%p247_p6)  ;;  %v540_v11 = vld [vmem:[%s2054_s3 + $0x18] sm:$0xff] (!%p247_p6)  ;;  %v541_v18 = vld [vmem:[%s2054_s3 + $0x20] sm:$0xff] (!%p247_p6)  ;;  %s278_s20 = sand.u32 (!%p247_p6), 1, %s1674_s24  }
   0xd   : > { %1505 = vmatprep.subr.bf16.mxu0 (!%p247_p6), %v1504_v3  ;;  %1536 = vmatprep.subr.bf16.mxu1 (!%p247_p6), %v1504_v3  ;;  %v1516_v17 = vpack.c.bf16 (!%p247_p6), %v540_v11, %v539_v10  ;;  %v542_v19 = vld [vmem:[%s2054_s3 + $0x28] sm:$0xff] (!%p247_p6)  ;;  %v543_v31 = vld [vmem:[%s2054_s3 + $0x30] sm:$0xff] (!%p247_p6)  ;;  %v544_v32 = vld [vmem:[%s2054_s3 + $0x38] sm:$0xff] (!%p247_p6)  ;;  %s1262_s21 = sshll.u32 (!%p247_p6), %s278_s20, 7 }
   0xe   : > { %1507 = vmatpush3.bf16.msra.mxu0 (!%p247_p6), %v1504_v3  ;;  %1538 = vmatpush3.bf16.msra.mxu1 (!%p247_p6), %v1504_v3  ;;  %v1520_v24 = vpack.c.bf16 (!%p247_p6), %v542_v19, %v541_v18  ;;  %v1524_v33 = vpack.c.bf16 (!%p247_p6), %v544_v32, %v543_v31  ;;  %v762_v34 = vld [vmem:[%s2056_s5] sm:$0xff] (!%p247_p6)  ;;  %v763_v35 = vld [vmem:[%s2056_s5 + $0x8] sm:$0xff] (!%p247_p6)  ;;  %v764_v36 = vld [vmem:[%s2056_s5 + $0x10] sm:$0xff] (!%p247_p6) }
   0xf   : > { %1509 = vmatprep.subr.bf16.mxu0 (!%p247_p6), %v1508_v5  ;;  %1537 = vmatprep.subr.bf16.mxu1 (!%p247_p6), %v1508_v5  ;;  %v1528_v37 = vpack.c.bf16 (!%p247_p6), %v763_v35, %v762_v34  ;;  %v765_v38 = vld [vmem:[%s2056_s5 + $0x18] sm:$0xff] (!%p247_p6)  ;;  %v1265_v40 = vld [vmem:[%s2053_s2] ss:$0 sm:$0xff] (!%p247_p6) }
  0x10   : > { %v1532_v39 = vpack.c.bf16 (!%p247_p6), %v765_v38, %v764_v36 }
  0x12   : > { %s287_s19 = scalar_select %p286_p7, %s1795_s16, 24  ;;  %1511 = vmatpush3.bf16.msra.mxu0 %v1508_v5  ;;  %1539 = vmatpush3.bf16.msra.mxu1 %v1508_v5 }
  0x13   : > { %1513 = vmatprep.subr.bf16.mxu1 %v1512_v8  ;;  %1529 = vmatprep.subr.bf16.mxu0 %v1528_v37  ;;  %s991_s24 = ssub.s32 (%p1781_p4), 25, %s1795_s16  ;;  %s1333_s29 = sshll.u32 (%p1781_p4), %s1769_s27, 7 }
  0x14   : > { %s1264_s26 = sshll.u32 %s287_s19, 3  ;;  %p992_p8 = scmp.lt.s32.totalorder (%p1781_p4), %s991_s24, 16 }
  0x15   : > { %s1811_s10 = scalar_lea.vmem %s2051_s0, %s1264_s26  ;;  %s1917_s26 = scalar_lea.vmem [#allocation2], %s1262_s21  }
  0x16   : > { %v300_v9 = vld [vmem:[%s1811_s10] sm:$0xff]  ;;  %v301_v12 = vld [vmem:[%s1811_s10 + $0x8] sm:$0xff]  ;;  %v302_v13 = vld [vmem:[%s1811_s10 + $0x10] sm:$0xff]  ;;  %s1958_s11 = scalar_lea.vmem (%p1781_p4), %s2058_s7, %s1333_s29  }
  0x17   : > { %1408 = vmatprep.mubr.msk.f32.mxu0 %vm327_vm0, %v300_v9  ;;  %v308_v14 = vld [vmem:[%s1811_s10 + $0x40] sm:$0xff]  ;;  %v309_v15 = vld [vmem:[%s1811_s10 + $0x48] sm:$0xff]  ;;  %v310_v16 = vld [vmem:[%s1811_s10 + $0x50] sm:$0xff] }
  0x18   : > { %1420 = vmatprep.mubr.msk.f32.mxu1 %vm327_vm0, %v308_v14  ;;  %1409 = vmatmul.mubr.msk.f32.vlgmr.msra.gmra.mrb[0].mxu0 %vm327_vm0, %v301_v12  ;;  %v303_v20 = vld [vmem:[%s1811_s10 + $0x18] sm:$0xff]  ;;  %v304_v21 = vld [vmem:[%s1811_s10 + $0x20] sm:$0xff]  ;;  %v305_v25 = vld [vmem:[%s1811_s10 + $0x28] sm:$0xff] }
  0x19   : > { %1411 = vmatprep.mubr.msk.f32.mxu0 %vm327_vm0, %v302_v13  ;;  %1421 = vmatmul.mubr.msk.f32.vlgmr.msra.gmra.mrb[0].mxu1 %vm327_vm0, %v309_v15  ;;  %v311_v22 = vld [vmem:[%s1811_s10 + $0x58] sm:$0xff]  ;;  %v312_v23 = vld [vmem:[%s1811_s10 + $0x60] sm:$0xff]  ;;  %v306_v26 = vld [vmem:[%s1811_s10 + $0x30] sm:$0xff] }
  0x1a   : > { %1423 = vmatprep.mubr.msk.f32.mxu1 %vm327_vm0, %v310_v16  ;;  %1515 = vmatpush3.bf16.msra.mxu1 %v1512_v8  ;;  %v313_v27 = vld [vmem:[%s1811_s10 + $0x68] sm:$0xff]  ;;  %v314_v28 = vld [vmem:[%s1811_s10 + $0x70] sm:$0xff]  ;;  %v307_v29 = vld [vmem:[%s1811_s10 + $0x38] sm:$0xff] }
  0x1b   : > { %1517 = vmatprep.subr.bf16.mxu1 %v1516_v17  ;;  %v315_v30 = vld [vmem:[%s1811_s10 + $0x78] sm:$0xff]  ;;  %1531 = vmatpush3.bf16.msra.mxu0 %v1528_v37 }
  0x1c   : > { %1412 = vmatmul.mubr.msk.f32.gmra.mrb[2].mxu0 %vm327_vm0, %v303_v20  ;;  %1533 = vmatprep.subr.bf16.mxu0 %v1532_v39 }
  0x1d   : > { %1414 = vmatprep.mubr.msk.f32.mxu0 %vm327_vm0, %v304_v21  ;;  %1424 = vmatmul.mubr.msk.f32.gmra.mrb[2].mxu1 %vm327_vm0, %v311_v22 }
  0x1e   : > { %1426 = vmatprep.mubr.msk.f32.mxu1 %vm327_vm0, %v312_v23  ;;  %1519 = vmatpush3.bf16.msra.mxu1 %v1516_v17 }
  0x1f   : > { %1521 = vmatprep.subr.bf16.mxu1 %v1520_v24  ;;  %1535 = vmatpush3.bf16.msra.mxu0 %v1532_v39 }
  0x20   : > { %1415 = vmatmul.mubr.msk.f32.gmra.mrb[4].mxu0 %vm327_vm0, %v305_v25  ;;  %v1282_v25 = vld [vmem:[%s2055_s4] ss:$0 sm:$0xff] }
  0x21   : > { %1417 = vmatprep.mubr.msk.f32.mxu0 %vm327_vm0, %v306_v26  ;;  %1427 = vmatmul.mubr.msk.f32.gmra.mrb[4].mxu1 %vm327_vm0, %v313_v27 }
  0x22   : > { %1429 = vmatprep.mubr.msk.f32.mxu1 %vm327_vm0, %v314_v28  ;;  %1523 = vmatpush3.bf16.msra.mxu1 %v1520_v24 }
  0x23   : > { %1525 = vmatprep.subr.bf16.mxu1 %v1524_v33 }
  0x24   : > { %1418 = vmatmul.mubr.msk.f32.gmra.mrb[6].mxu0 %vm327_vm0, %v307_v29 }
  0x25   : > { %1430 = vmatmul.mubr.msk.f32.gmra.mrb[6].mxu1 %vm327_vm0, %v315_v30 }
  0x26   : > { %1527 = vmatpush3.bf16.msra.mxu1 %v1524_v33 }
  0xeb   : > { %v1410_v41 = vpop.f32.mrb[0].mxu0 }
  0xec   : > { %v448_v42 = vadd.f32 %v1410_v41, %v1265_v40  ;;  %v442_v43 = vpop.f32.mrb[1].mxu0  ;;  %v1422_v44 = vpop.f32.mrb[0].mxu1 }
  0xed   : > { %v443_v45 = vadd.f32 %v1265_v40, %v442_v43  ;;  %v482_v46 = vpop.f32.mrb[1].mxu1  ;;  %v488_v12 = vadd.f32 %v1422_v44, %v1265_v40 }
  0xee   : > { %v522_v49 = vmax.f32 %v448_v42, 0.0  ;;  %v483_v1 = vadd.f32 %v1265_v40, %v482_v46 }
  0xef   : > { %v521_v47 = vmax.f32 %v443_v45, 0.0  ;;  %v1413_v48 = vpop.f32.mrb[2].mxu0  ;;  %v530_v15 = vmax.f32 %v488_v12, 0.0 }
  0xf0   : > { %v458_v50 = vadd.f32 %v1413_v48, %v1265_v40  ;;  %v452_v51 = vpop.f32.mrb[3].mxu0  ;;  %v1425_v52 = vpop.f32.mrb[2].mxu1  ;;  %v529_v9 = vmax.f32 %v483_v1, 0.0 }
  0xf1   : > { %v453_v53 = vadd.f32 %v1265_v40, %v452_v51  ;;  %1448 = vmatprep.mubr.msk.f32.mxu1 %vm552_vm1, %v521_v47  ;;  %v492_v54 = vpop.f32.mrb[3].mxu1  ;;  %v498_v16 = vadd.f32 %v1425_v52, %v1265_v40 }
  0xf2   : > { %1449 = vmatmul.mubr.msk.f32.vlgmr.msra.gmra.mrb[8].mxu1 %vm552_vm1, %v522_v49  ;;  %v524_v57 = vmax.f32 %v458_v50, 0.0  ;;  %v493_v10 = vadd.f32 %v1265_v40, %v492_v54 }
  0xf3   : > { %v523_v55 = vmax.f32 %v453_v53, 0.0  ;;  %v1416_v56 = vpop.f32.mrb[4].mxu0  ;;  %v532_v19 = vmax.f32 %v498_v16, 0.0 }
  0xf4   : > { %v468_v58 = vadd.f32 %v1416_v56, %v1265_v40  ;;  %v462_v59 = vpop.f32.mrb[5].mxu0  ;;  %v1428_v60 = vpop.f32.mrb[4].mxu1  ;;  %v531_v13 = vmax.f32 %v493_v10, 0.0  ;;  %v1299_v10 = vld [vmem:[%s2057_s6] ss:$0 sm:$0xff] }
  0xf5   : > { %v463_v61 = vadd.f32 %v1265_v40, %v462_v59  ;;  %1451 = vmatprep.mubr.msk.f32.mxu1 %vm552_vm1, %v523_v55  ;;  %v502_v62 = vpop.f32.mrb[5].mxu1  ;;  %v508_v20 = vadd.f32 %v1428_v60, %v1265_v40 }
  0xf6   : > { %1452 = vmatmul.mubr.msk.f32.gmra.mrb[10].mxu1 %vm552_vm1, %v524_v57  ;;  %v526_v2 = vmax.f32 %v468_v58, 0.0  ;;  %v503_v14 = vadd.f32 %v1265_v40, %v502_v62 }
  0xf7   : > { %v525_v63 = vmax.f32 %v463_v61, 0.0  ;;  %v1419_v0 = vpop.f32.mrb[6].mxu0  ;;  %v534_v22 = vmax.f32 %v508_v20, 0.0 }
  0xf8   : > { %v478_v3 = vadd.f32 %v1419_v0, %v1265_v40  ;;  %v472_v4 = vpop.f32.mrb[7].mxu0  ;;  %v1431_v5 = vpop.f32.mrb[6].mxu1  ;;  %v533_v17 = vmax.f32 %v503_v14, 0.0 }
  0xf9   : > { %v473_v6 = vadd.f32 %v1265_v40, %v472_v4  ;;  %1454 = vmatprep.mubr.msk.f32.mxu1 %vm552_vm1, %v525_v63  ;;  %v512_v7 = vpop.f32.mrb[7].mxu1  ;;  %v518_v23 = vadd.f32 %v1431_v5, %v1265_v40 }
  0xfa   : > { %1455 = vmatmul.mubr.msk.f32.gmra.mrb[12].mxu1 %vm552_vm1, %v526_v2  ;;  %v528_v11 = vmax.f32 %v478_v3, 0.0  ;;  %v513_v18 = vadd.f32 %v1265_v40, %v512_v7 }
  0xfb   : > { %v527_v8 = vmax.f32 %v473_v6, 0.0  ;;  %v536_v24 = vmax.f32 %v518_v23, 0.0 }
  0xfc   : > { %v535_v21 = vmax.f32 %v513_v18, 0.0 }
  0xfd   : > { %1457 = vmatprep.mubr.msk.f32.mxu1 %vm552_vm1, %v527_v8 }
  0xfe   : > { %1458 = vmatmul.mubr.msk.f32.gmra.mrb[14].mxu1 %vm552_vm1, %v528_v11 }
  0xff   : > { %1460 = vmatprep.mubr.msk.f32.mxu1 %vm552_vm1, %v529_v9 }
 0x102   : > { %1461 = vmatmul.mubr.msk.f32.gmra.mrb[16].mxu1 %vm552_vm1, %v530_v15 }
 0x103   : > { %1463 = vmatprep.mubr.msk.f32.mxu1 %vm552_vm1, %v531_v13 }
 0x106   : > { %1464 = vmatmul.mubr.msk.f32.gmra.mrb[18].mxu1 %vm552_vm1, %v532_v19 }
 0x107   : > { %1466 = vmatprep.mubr.msk.f32.mxu1 %vm552_vm1, %v533_v17 }
 0x10a   : > { %1467 = vmatmul.mubr.msk.f32.gmra.mrb[20].mxu1 %vm552_vm1, %v534_v22 }
 0x10b   : > { %1469 = vmatprep.mubr.msk.f32.mxu1 %vm552_vm1, %v535_v21 }
 0x10e   : > { %1470 = vmatmul.mubr.msk.f32.gmra.mrb[22].mxu1 %vm552_vm1, %v536_v24 }
 0x1c5   : > { %v1450_v26 = vpop.f32.mrb[8].mxu1 }
 0x1c6   : > { %v673_v27 = vadd.f32 %v1450_v26, %v1282_v25  ;;  %v667_v28 = vpop.f32.mrb[9].mxu1 }
 0x1c7   : > { %v668_v29 = vadd.f32 %v1282_v25, %v667_v28 }
 0x1c8   : > { %v747_v32 = vmax.f32 %v673_v27, 0.0 }
 0x1c9   : > { %v746_v30 = vmax.f32 %v668_v29, 0.0  ;;  %v1453_v31 = vpop.f32.mrb[10].mxu1 }
 0x1ca   : > { %v683_v33 = vadd.f32 %v1453_v31, %v1282_v25  ;;  %v677_v34 = vpop.f32.mrb[11].mxu1 }
 0x1cb   : > { %v678_v35 = vadd.f32 %v1282_v25, %v677_v34  ;;  %1480 = vmatprep.mubr.msk.f32.mxu0 %vm327_vm0, %v746_v30 }
 0x1cc   : > { %1481 = vmatmul.mubr.msk.f32.vlgmr.msra.gmra.mrb[8].mxu0 %vm327_vm0, %v747_v32  ;;  %v749_v38 = vmax.f32 %v683_v33, 0.0 }
 0x1cd   : > { %v748_v36 = vmax.f32 %v678_v35, 0.0  ;;  %v1456_v37 = vpop.f32.mrb[12].mxu1 }
 0x1ce   : > { %v693_v39 = vadd.f32 %v1456_v37, %v1282_v25  ;;  %v687_v40 = vpop.f32.mrb[13].mxu1 }
 0x1cf   : > { %v688_v41 = vadd.f32 %v1282_v25, %v687_v40  ;;  %1483 = vmatprep.mubr.msk.f32.mxu0 %vm327_vm0, %v748_v36 }
 0x1d0   : > { %1484 = vmatmul.mubr.msk.f32.gmra.mrb[10].mxu0 %vm327_vm0, %v749_v38  ;;  %v751_v44 = vmax.f32 %v693_v39, 0.0 }
 0x1d1   : > { %v750_v42 = vmax.f32 %v688_v41, 0.0  ;;  %v1459_v43 = vpop.f32.mrb[14].mxu1 }
 0x1d2   : > { %v703_v45 = vadd.f32 %v1459_v43, %v1282_v25  ;;  %v697_v46 = vpop.f32.mrb[15].mxu1 }
 0x1d3   : > { %v698_v47 = vadd.f32 %v1282_v25, %v697_v46  ;;  %1486 = vmatprep.mubr.msk.f32.mxu0 %vm327_vm0, %v750_v42 }
 0x1d4   : > { %1487 = vmatmul.mubr.msk.f32.gmra.mrb[12].mxu0 %vm327_vm0, %v751_v44  ;;  %v753_v50 = vmax.f32 %v703_v45, 0.0 }
 0x1d5   : > { %v752_v48 = vmax.f32 %v698_v47, 0.0  ;;  %v1462_v49 = vpop.f32.mrb[16].mxu1 }
 0x1d6   : > { %v713_v51 = vadd.f32 %v1462_v49, %v1282_v25  ;;  %v707_v52 = vpop.f32.mrb[17].mxu1 }
 0x1d7   : > { %v708_v53 = vadd.f32 %v1282_v25, %v707_v52  ;;  %1489 = vmatprep.mubr.msk.f32.mxu0 %vm327_vm0, %v752_v48 }
 0x1d8   : > { %1490 = vmatmul.mubr.msk.f32.gmra.mrb[14].mxu0 %vm327_vm0, %v753_v50  ;;  %v755_v56 = vmax.f32 %v713_v51, 0.0 }
 0x1d9   : > { %v754_v54 = vmax.f32 %v708_v53, 0.0  ;;  %v1465_v55 = vpop.f32.mrb[18].mxu1 }
 0x1da   : > { %v723_v57 = vadd.f32 %v1465_v55, %v1282_v25  ;;  %v717_v58 = vpop.f32.mrb[19].mxu1 }
 0x1db   : > { %v718_v59 = vadd.f32 %v1282_v25, %v717_v58  ;;  %1492 = vmatprep.mubr.msk.f32.mxu0 %vm327_vm0, %v754_v54 }
 0x1dc   : > { %1493 = vmatmul.mubr.msk.f32.gmra.mrb[16].mxu0 %vm327_vm0, %v755_v56  ;;  %v757_v62 = vmax.f32 %v723_v57, 0.0 }
 0x1dd   : > { %v756_v60 = vmax.f32 %v718_v59, 0.0  ;;  %v1468_v61 = vpop.f32.mrb[20].mxu1 }
 0x1de   : > { %v733_v63 = vadd.f32 %v1468_v61, %v1282_v25  ;;  %v727_v0 = vpop.f32.mrb[21].mxu1 }
 0x1df   : > { %v728_v1 = vadd.f32 %v1282_v25, %v727_v0  ;;  %1495 = vmatprep.mubr.msk.f32.mxu0 %vm327_vm0, %v756_v60 }
 0x1e0   : > { %1496 = vmatmul.mubr.msk.f32.gmra.mrb[18].mxu0 %vm327_vm0, %v757_v62  ;;  %v759_v4 = vmax.f32 %v733_v63, 0.0 }
 0x1e1   : > { %v758_v2 = vmax.f32 %v728_v1, 0.0  ;;  %v1471_v3 = vpop.f32.mrb[22].mxu1 }
 0x1e2   : > { %v743_v5 = vadd.f32 %v1471_v3, %v1282_v25  ;;  %v737_v6 = vpop.f32.mrb[23].mxu1 }
 0x1e3   : > { %v738_v7 = vadd.f32 %v1282_v25, %v737_v6  ;;  %1498 = vmatprep.mubr.msk.f32.mxu0 %vm327_vm0, %v758_v2 }
 0x1e4   : > { %1499 = vmatmul.mubr.msk.f32.gmra.mrb[20].mxu0 %vm327_vm0, %v759_v4  ;;  %v761_v9 = vmax.f32 %v743_v5, 0.0 }
 0x1e5   : > { %v760_v8 = vmax.f32 %v738_v7, 0.0 }
 0x1e7   : > { %1501 = vmatprep.mubr.msk.f32.mxu0 %vm327_vm0, %v760_v8 }
 0x1e8   : > { %1502 = vmatmul.mubr.msk.f32.gmra.mrb[22].mxu0 %vm327_vm0, %v761_v9 }
 0x29f   : > { %v1482_v11 = vpop.f32.mrb[8].mxu0 }
 0x2a0   : > { %v893_v12 = vadd.f32 %v1482_v11, %v1299_v10  ;;  %v887_v13 = vpop.f32.mrb[9].mxu0 }
 0x2a1   : > { %v888_v14 = vadd.f32 %v1299_v10, %v887_v13 }
 0x2a2   : > { %968 = vst.msk [vmem:[%s1917_s26 + $0x8] sm:$0xff] %vm966_vm2, %v893_v12 }
 0x2a3   : > { %967 = vst.msk [vmem:[%s1917_s26] sm:$0xff] %vm966_vm2, %v888_v14  ;;  %v1485_v15 = vpop.f32.mrb[10].mxu0 }
 0x2a4   : > { %v903_v16 = vadd.f32 %v1485_v15, %v1299_v10  ;;  %v897_v17 = vpop.f32.mrb[11].mxu0 }
 0x2a5   : > { %v898_v18 = vadd.f32 %v1299_v10, %v897_v17 }
 0x2a6   : > { %970 = vst.msk [vmem:[%s1917_s26 + $0x18] sm:$0xff] %vm966_vm2, %v903_v16 }
 0x2a7   : > { %969 = vst.msk [vmem:[%s1917_s26 + $0x10] sm:$0xff] %vm966_vm2, %v898_v18  ;;  %v1488_v19 = vpop.f32.mrb[12].mxu0 }
 0x2a8   : > { %v913_v20 = vadd.f32 %v1488_v19, %v1299_v10  ;;  %v907_v21 = vpop.f32.mrb[13].mxu0 }
 0x2a9   : > { %v908_v22 = vadd.f32 %v1299_v10, %v907_v21 }
 0x2aa   : > { %972 = vst.msk [vmem:[%s1917_s26 + $0x28] sm:$0xff] %vm966_vm2, %v913_v20 }
 0x2ab   : > { %971 = vst.msk [vmem:[%s1917_s26 + $0x20] sm:$0xff] %vm966_vm2, %v908_v22  ;;  %v1491_v23 = vpop.f32.mrb[14].mxu0 }
 0x2ac   : > { %v923_v24 = vadd.f32 %v1491_v23, %v1299_v10  ;;  %v917_v25 = vpop.f32.mrb[15].mxu0 }
 0x2ad   : > { %v918_v26 = vadd.f32 %v1299_v10, %v917_v25 }
 0x2ae   : > { %974 = vst.msk [vmem:[%s1917_s26 + $0x38] sm:$0xff] %vm966_vm2, %v923_v24 }
 0x2af   : > { %973 = vst.msk [vmem:[%s1917_s26 + $0x30] sm:$0xff] %vm966_vm2, %v918_v26  ;;  %v1494_v27 = vpop.f32.mrb[16].mxu0 }
 0x2b0   : > { %v933_v28 = vadd.f32 %v1494_v27, %v1299_v10  ;;  %v927_v29 = vpop.f32.mrb[17].mxu0 }
 0x2b1   : > { %v928_v30 = vadd.f32 %v1299_v10, %v927_v29 }
 0x2b2   : > { %976 = vst.msk [vmem:[%s1917_s26 + $0x48] sm:$0xff] %vm966_vm2, %v933_v28 }
 0x2b3   : > { %975 = vst.msk [vmem:[%s1917_s26 + $0x40] sm:$0xff] %vm966_vm2, %v928_v30  ;;  %v1497_v31 = vpop.f32.mrb[18].mxu0 }
 0x2b4   : > { %v943_v32 = vadd.f32 %v1497_v31, %v1299_v10  ;;  %v937_v33 = vpop.f32.mrb[19].mxu0 }
 0x2b5   : > { %v938_v34 = vadd.f32 %v1299_v10, %v937_v33 }
 0x2b6   : > { %978 = vst.msk [vmem:[%s1917_s26 + $0x58] sm:$0xff] %vm966_vm2, %v943_v32 }
 0x2b7   : > { %977 = vst.msk [vmem:[%s1917_s26 + $0x50] sm:$0xff] %vm966_vm2, %v938_v34  ;;  %v1500_v35 = vpop.f32.mrb[20].mxu0 }
 0x2b8   : > { %v953_v36 = vadd.f32 %v1500_v35, %v1299_v10  ;;  %v947_v37 = vpop.f32.mrb[21].mxu0 }
 0x2b9   : > { %v948_v38 = vadd.f32 %v1299_v10, %v947_v37  ;;  %989 = sbr.rel (!%p1781_p4) target bundleno = 753 (0x2f1), region = 52 }
 0x2ba   : > { %980 = vst.msk [vmem:[%s1917_s26 + $0x68] sm:$0xff] %vm966_vm2, %v953_v36 }
 0x2bb   : > { %979 = vst.msk [vmem:[%s1917_s26 + $0x60] sm:$0xff] %vm966_vm2, %v948_v38  ;;  %v1503_v39 = vpop.f32.mrb[22].mxu0 }
 0x2bc   : > { %v963_v40 = vadd.f32 %v1503_v39, %v1299_v10  ;;  %v957_v41 = vpop.f32.mrb[23].mxu0 }
 0x2bd   : > { %v958_v42 = vadd.f32 %v1299_v10, %v957_v41 }
 0x2be   : > { %982 = vst.msk [vmem:[%s1917_s26 + $0x78] sm:$0xff] %vm966_vm2, %v963_v40 }
 0x2bf   : > { %981 = vst.msk [vmem:[%s1917_s26 + $0x70] sm:$0xff] %vm966_vm2, %v958_v42 }
 0x2c0   : > { %s2067_s24 = smov (!%p992_p8, %s991_s24), 16 }
 0x2c1   : > { %s1318_s12 = sshll.u32 %s2067_s24, 7 }
 0x2c2   : > { %p1321_p9 = scmp.eq.s32.totalorder %s1318_s12, 0 }
 0x2c3   : > { %s1964_s13 = sshrl.u32 (!%p1321_p9), %s2067_s24, 4 }
 0x2c4   : > { %1000 = sbr.rel (%p1321_p9) target bundleno = 753 (0x2f1), region = 56  ;;  %p1322_p10 = scmp.le.s32.totalorder (!%p1321_p9), %s1964_s13, 0 }
 0x2cb   : > { %1214 = sbr.rel (%p1322_p10) target bundleno = 732 (0x2dc), region = 132  ;;  %s2060_s27 = smov (!%p1322_p10), %s1958_s11 }
 0x2cc   : > { %s2061_s9 = smov (!%p1322_p10), %s1917_s26  ;;  %s1973_s16 = smov (!%p1322_p10), 0  }
 0x2cd   : > { %s1975_s14 = smov (!%p1322_p10), 0  }
 0x2d2 LB: >> { %v1092_v43 = vld [vmem:[%s1690_s9] sm:$0xff]  ;;  %v1094_v44 = vld [vmem:[%s1690_s9 + $0x8] sm:$0xff]  ;;  %v1096_v45 = vld [vmem:[%s1690_s9 + $0x10] sm:$0xff]  ;;  %s1124_s15 = sadd.s32 1, %s1694_s16  ;;  %s1086_s14 = sadd.s32 1, %s1698_s14   ;;  %s1698_s14 = sphi %s1975_s14, %s1086_s14   ;;  %s1694_s16 = sphi %s1973_s16, %s2062_s16   ;;  %s1690_s9 = sphi %s2061_s9, %s1129_s9   ;;  %s1686_s27 = sphi %s2060_s27, %s1130_s27  }
 0x2d3   : >> { %1093 = vst [vmem:[%s1686_s27] sm:$0xff] %v1092_v43  ;;  %1095 = vst [vmem:[%s1686_s27 + $0x8] sm:$0xff] %v1094_v44  ;;  %v1098_v46 = vld [vmem:[%s1690_s9 + $0x18] sm:$0xff]  ;;  %v1100_v47 = vld [vmem:[%s1690_s9 + $0x20] sm:$0xff]  ;;  %p1125_p11 = scmp.ge.s32.totalorder %s1124_s15, %s1964_s13  ;;  %p1085_p12 = scmp.ge.s32.totalorder %s1086_s14, %s1964_s13 }
 0x2d4   : >> { %1097 = vst [vmem:[%s1686_s27 + $0x10] sm:$0xff] %v1096_v45  ;;  %v1102_v48 = vld [vmem:[%s1690_s9 + $0x28] sm:$0xff]  ;;  %1099 = vst [vmem:[%s1686_s27 + $0x18] sm:$0xff] %v1098_v46  ;;  %v1104_v49 = vld [vmem:[%s1690_s9 + $0x30] sm:$0xff] }
 0x2d5   : >> { %1101 = vst [vmem:[%s1686_s27 + $0x20] sm:$0xff] %v1100_v47  ;;  %1103 = vst [vmem:[%s1686_s27 + $0x28] sm:$0xff] %v1102_v48  ;;  %v1106_v50 = vld [vmem:[%s1690_s9 + $0x38] sm:$0xff]  ;;  %v1108_v51 = vld [vmem:[%s1690_s9 + $0x40] sm:$0xff]  ;;  %s2069_s15 = smov (%p1125_p11, %s1124_s15), 0  ;;  %1088 = sbr.rel (!%p1085_p12) target bundleno = 722 (0x2d2), region = 138 }
 0x2d6   : >> { %1105 = vst [vmem:[%s1686_s27 + $0x30] sm:$0xff] %v1104_v49  ;;  %1107 = vst [vmem:[%s1686_s27 + $0x38] sm:$0xff] %v1106_v50  ;;  %v1110_v52 = vld [vmem:[%s1690_s9 + $0x48] sm:$0xff]  ;;  %v1112_v53 = vld [vmem:[%s1690_s9 + $0x50] sm:$0xff]  ;;  %s1323_s17 = sshll.u32 %s2069_s15, 7  ;;  %s2062_s16 = smov %s2069_s15 }
 0x2d7   : >> { %1109 = vst [vmem:[%s1686_s27 + $0x40] sm:$0xff] %v1108_v51  ;;  %v1114_v54 = vld [vmem:[%s1690_s9 + $0x58] sm:$0xff]  ;;  %1111 = vst [vmem:[%s1686_s27 + $0x48] sm:$0xff] %v1110_v52  ;;  %v1116_v55 = vld [vmem:[%s1690_s9 + $0x60] sm:$0xff] }
 0x2d8   : >> { %1113 = vst [vmem:[%s1686_s27 + $0x50] sm:$0xff] %v1112_v53  ;;  %1115 = vst [vmem:[%s1686_s27 + $0x58] sm:$0xff] %v1114_v54  ;;  %v1118_v56 = vld [vmem:[%s1690_s9 + $0x68] sm:$0xff]  ;;  %v1120_v57 = vld [vmem:[%s1690_s9 + $0x70] sm:$0xff] }
 0x2d9   : >> { %1117 = vst [vmem:[%s1686_s27 + $0x60] sm:$0xff] %v1116_v55  ;;  %1119 = vst [vmem:[%s1686_s27 + $0x68] sm:$0xff] %v1118_v56  ;;  %v1122_v58 = vld [vmem:[%s1690_s9 + $0x78] sm:$0xff]  ;;  %s1129_s9 = scalar_lea.vmem %s1917_s26, %s1323_s17 [#allocation2]  }
 0x2da   : >> { %1121 = vst [vmem:[%s1686_s27 + $0x70] sm:$0xff] %v1120_v57  ;;  %1123 = vst [vmem:[%s1686_s27 + $0x78] sm:$0xff] %v1122_v58  ;;  %s1130_s27 = scalar_lea.vmem %s1958_s11, %s1323_s17  }
 0x2dc PF: > { %s2033_s18 = sand.u32 15, %s2067_s24   ;;  %s1334_s19 = sshll.u32 %s1964_s13, 7 }
 0x2dd   : > { %s1135_s20 = scalar_lea.vmem %s1917_s26, %s1334_s19 [#allocation2]   ;;  %s1137_s21 = scalar_lea.vmem %s1958_s11, %s1334_s19  }
 0x2de   : > { %p1328_p13 = scmp.le.s32.totalorder %s2033_s18, 0 }
 0x2df   : > { %s1700_s22 = smov (!%p1328_p13), %s1137_s21   ;;  %s1704_s23 = smov (!%p1328_p13), %s1135_s20  }
 0x2e0   : > { %1228 = sbr.rel (%p1328_p13) target bundleno = 753 (0x2f1), region = 143  ;;  %s1708_s29 = smov (!%p1328_p13), 0  }
 0x2e1   : > { %s1712_s30 = smov (!%p1328_p13), 0  }
 0x2e7 LB: >> { %v1147_v59 = vld [vmem:[%s1706_s23] sm:$0xff]  ;;  %s1149_s24 = sadd.s32 1, %s1710_s29  ;;  %s1141_s30 = sadd.s32 1, %s1714_s30   ;;  %s1714_s30 = sphi %s1712_s30, %s1141_s30   ;;  %s1710_s29 = sphi %s1708_s29, %s1709_s29   ;;  %s1706_s23 = sphi %s1704_s23, %s1154_s23   ;;  %s1702_s22 = sphi %s1700_s22, %s1155_s22  }
 0x2e8   : >> { %1148 = vst [vmem:[%s1702_s22] sm:$0xff] %v1147_v59  ;;  %p1150_p0 = scmp.ge.s32.totalorder %s1149_s24, %s2033_s18  ;;  %p1140_p1 = scmp.ge.s32.totalorder %s1141_s30, %s2033_s18 }
 0x2ea   : >> { %s2071_s24 = smov (%p1150_p0, %s1149_s24), 0  ;;  %1143 = sbr.rel (!%p1140_p1) target bundleno = 743 (0x2e7), region = 149 }
 0x2eb   : >> { %s1329_s26 = sshll.u32 %s2071_s24, 3  ;;  %s1709_s29 = smov %s2071_s24  }
 0x2ec   : >> { %s1154_s23 = scalar_lea.vmem %s1135_s20, %s1329_s26 [#allocation2]   ;;  %s1155_s22 = scalar_lea.vmem %s1137_s21, %s1329_s26  }
 0x2f1 PF: > { %p14_p2 = scmp.ge.s32.totalorder %s1771_s28, 4   ;;  %s2063_s24 = smov %s1678_s25 }
 0x2f2   : > { %s2064_s25 = smov %s1779_s8  ;;  %s2065_s26 = smov %s1771_s28 }
 0x2f3   :  { %16 = sbr.rel (!%p14_p2) target bundleno = 2 (0x2), region = 160 }

</bundles_post_ra>
